<compile_context>
chip_gen: v7x
topology: tpu7x:2x2x1
jax: 0.10.0
libtpu: 0.0.40
codegen_flags: <defaults>
</compile_context>

<pallas_src>
import jax
import jax.numpy as jnp
from jax import lax
from jax.experimental import pallas as pl
from jax.experimental.pallas import tpu as pltpu

# ---- problem sizes (small, consistent with the module's forward) ----
BATCH = 2          # must be even; split into 2 branches of BATCH // 2 = 1 sample each
C_IN = 4
H = W = 16
C_OUT = 8          # conv output channels
D = 32             # feature dimension (dim1 in the PyTorch code)
HW = H * W
K_IM2COL = 9 * C_IN + 1   # 9 conv taps * C_IN channels + 1 bias row
K_LIN = C_OUT + 1         # linear weights + folded bias column


def siamese_fused_kernel(cols_ref, w1_ref, w2_ref, o_ref):
    """Single fused step covering both shared-weight siamese branches.

    cols_ref: (K_IM2COL, BATCH*H*W) = (37, 512) bf16  im2col'ed input (+ ones bias row)
    w1_ref  : (C_OUT, K_IM2COL)     = (8, 37)   bf16  conv weights (+ bias column)
    w2_ref  : (D, C_OUT + 1)        = (32, 9)   f32   [w2 * (1/HW) | b2]
    o_ref   : (D, BATCH)            = (32, 2)   f32   column b = features of branch b
    """
    # 3x3 conv (padding=1) + bias for BOTH branches as one bf16 MXU matmul (f32 acc).
    conv = jnp.dot(w1_ref[...], cols_ref[...],
                   preferred_element_type=jnp.float32)           # (C_OUT, BATCH*H*W)
    relu = jnp.maximum(conv, 0.0)

    # Per-branch global average pool on the XLU (lane reductions over the two
    # lane-tile-aligned 256-column halves). The 1/HW scale is pre-folded into w2_ref.
    p0 = jnp.sum(relu[:, :HW], axis=-1, keepdims=True)           # (C_OUT, 1) branch 0
    p1 = jnp.sum(relu[:, HW:], axis=-1, keepdims=True)           # (C_OUT, 1) branch 1
    # Merge the two branch columns with a lane-select (avoids an unaligned lane concat).
    lane = lax.broadcasted_iota(jnp.int32, (C_OUT, BATCH), 1)
    pooled = jnp.where(lane == 0, p0, p1)                        # (C_OUT, BATCH)

    # Shared final linear applied to both branches at once; b2 rides as the last
    # column of w2_ref (one parameter block, one DMA).
    w2m = w2_ref[:, :C_OUT]                                      # (D, C_OUT), pre-scaled
    b2c = w2_ref[:, C_OUT:]                                      # (D, 1)
    o_ref[...] = jnp.dot(w2m, pooled,
                         preferred_element_type=jnp.float32) + b2c


def prepare_params(w1, b1, w2, b2):
    """One-time parameter repacking (hoisted out of the per-call path)."""
    w1 = w1.astype(jnp.float32)
    b1 = b1.astype(jnp.float32)
    w2 = w2.astype(jnp.float32)
    b2 = b2.astype(jnp.float32)
    # conv weights (C_OUT, C_IN, 3, 3) -> (C_OUT, 9*C_IN) with (ky, kx, c) ordering
    # matching the im2col rows; append b1 as the bias column; cast to bf16 for the MXU.
    w1_col = jnp.transpose(w1, (0, 2, 3, 1)).reshape(C_OUT, 9 * C_IN)
    w1_aug = jnp.concatenate([w1_col, b1[:, None]], axis=1).astype(jnp.bfloat16)  # (8, 37)
    # final linear: fold the 1/HW pool scale (exact, HW = 2^8) and b2 into one block.
    w2_aug = jnp.concatenate([w2 * (1.0 / HW), b2[:, None]], axis=1)               # (32, 9)
    return w1_aug, w2_aug


@jax.jit
def siamese_forward(x, w1_aug, w2_aug):
    """x: (BATCH, C_IN, H, W) NCHW.  Returns o: (2*D,) flat vector (o1 then o2)."""
    assert x.shape[0] % 2 == 0 and x.shape[0] // 2 == 1, \
        "PyTorch forward writes o1/o2 (shape (1,D)) into 1-D slices -> half-batch must be 1"
    B = x.shape[0]
    x = x.astype(jnp.float32)

    # ---- wrapper-side im2col (fused by XLA under jit) ----
    # TODO(synk): if profiling shows this XLA chain dominating the latency-bound
    # kernel, move the 9 conv taps in-kernel (pass padded x, accumulate 9 matmuls).
    x_pad = jnp.pad(x, ((0, 0), (0, 0), (1, 1), (1, 1)))
    taps = [x_pad[:, :, ky:ky + H, kx:kx + W]          # each (B, C_IN, H, W)
            for ky in range(3) for kx in range(3)]
    cols = jnp.stack(taps, axis=1)                      # (B, 9, C_IN, H, W)
    cols = cols.reshape(B, 9 * C_IN, HW)                # row = tap*C_IN + c
    cols = jnp.transpose(cols, (1, 0, 2)).reshape(9 * C_IN, B * HW)   # col = b*HW + n
    ones = jnp.ones((1, B * HW), jnp.float32)
    cols_aug = jnp.concatenate([cols, ones], axis=0).astype(jnp.bfloat16)  # (37, 512)

    out_t = pl.pallas_call(
        siamese_fused_kernel,
        out_shape=jax.ShapeDtypeStruct((D, B), jnp.float32),
        grid_spec=pltpu.PrefetchScalarGridSpec(
            num_scalar_prefetch=0,
            grid=(1,),   # single fused step: both shared-weight branches together
            in_specs=[
                pl.BlockSpec((K_IM2COL, B * HW), lambda i: (0, 0)),
                pl.BlockSpec((C_OUT, K_IM2COL), lambda i: (0, 0)),
                pl.BlockSpec((D, K_LIN), lambda i: (0, 0)),
            ],
            out_specs=pl.BlockSpec((D, B), lambda i: (0, 0)),
        ),
        compiler_params=pltpu.CompilerParams(
            dimension_semantics=("arbitrary",)),
    )(cols_aug, w1_aug, w2_aug)

    # o[:D] = o1 (branch 0), o[D:] = o2 (branch 1) -> flat (2*D,) vector.
    return out_t.T.reshape(-1)


def _reference(x, w1, b1, w2, b2, quantize_conv_inputs=False):
    """Pure-JAX reference. With quantize_conv_inputs=True it mirrors the kernel's
    bf16 conv inputs (f32 accumulation) for a tight comparison."""
    x = x.astype(jnp.float32)
    w1 = w1.astype(jnp.float32)
    b1 = b1.astype(jnp.float32)
    if quantize_conv_inputs:
        x = x.astype(jnp.bfloat16).astype(jnp.float32)
        w1 = w1.astype(jnp.bfloat16).astype(jnp.float32)
        b1 = b1.astype(jnp.bfloat16).astype(jnp.float32)
    x_pad = jnp.pad(x, ((0, 0), (0, 0), (1, 1), (1, 1)))
    outs = []
    for n in range(x.shape[0]):
        acc = jnp.zeros((C_OUT, HW), jnp.float32)
        for ky in range(3):
            for kx in range(3):
                win = x_pad[n, :, ky:ky + H, kx:kx + W].reshape(C_IN, HW)
                acc = acc + w1[:, :, ky, kx] @ win
        relu = jnp.maximum(acc + b1[:, None], 0.0)
        pooled = jnp.mean(relu, axis=-1)
        outs.append(w2.astype(jnp.float32) @ pooled + b2.astype(jnp.float32))
    return jnp.concatenate(outs, axis=0)


if __name__ == "__main__":
    key = jax.random.PRNGKey(0)
    kx, kw1, kb1, kw2, kb2 = jax.random.split(key, 5)

    # deterministic synthetic parameters (shapes from the chosen `features` net)
    x = jax.random.normal(kx, (BATCH, C_IN, H, W), dtype=jnp.float32)
    w1 = 0.1 * jax.random.normal(kw1, (C_OUT, C_IN, 3, 3), dtype=jnp.float32)
    b1 = 0.1 * jax.random.normal(kb1, (C_OUT,), dtype=jnp.float32)
    w2 = 0.1 * jax.random.normal(kw2, (D, C_OUT), dtype=jnp.float32)
    b2 = 0.1 * jax.random.normal(kb2, (D,), dtype=jnp.float32)

    # One-time parameter repacking (not part of the per-forward path).
    w1_aug, w2_aug = prepare_params(w1, b1, w2, b2)

    o = siamese_forward(x, w1_aug, w2_aug)
    o = jax.block_until_ready(o)
    assert o.shape == (2 * D,)

    # Tight check against a reference that mirrors the kernel's bf16 conv inputs.
    ref_q = _reference(x, w1, b1, w2, b2, quantize_conv_inputs=True)
    assert jnp.allclose(o, ref_q, atol=1e-3, rtol=1e-3), "mismatch vs bf16-input reference"
    # Loose check against the full-f32 reference (bf16 cast of conv inputs only).
    ref_f32 = _reference(x, w1, b1, w2, b2)
    assert jnp.allclose(o, ref_f32, atol=2e-2, rtol=2e-2), "mismatch vs f32 reference"

    print("KERNEL_OK")
</pallas_src>

<mosaic_0001>
module attributes {stable_mosaic.version = 11 : i64} {
  func.func @siamese_fused_kernel(%arg0: i32, %arg1: memref<37x512xbf16, #tpu.memory_space<vmem>>, %arg2: memref<8x37xbf16, #tpu.memory_space<vmem>>, %arg3: memref<32x9xf32, #tpu.memory_space<vmem>>, %arg4: memref<32x2xf32, #tpu.memory_space<vmem>>) attributes {dimension_semantics = [#tpu.dimension_semantics<arbitrary>], iteration_bounds = array<i64: 1>, scalar_prefetch = 0 : i64, scratch_operands = 0 : i64, tpu.core_type = #tpu.core_type<tc>, window_params = [{pipeline_mode = #tpu.pipeline_mode<synchronous>, transform_indices = @transform_0, window_bounds = array<i64: 37, 512>}, {pipeline_mode = #tpu.pipeline_mode<synchronous>, transform_indices = @transform_1, window_bounds = array<i64: 8, 37>}, {pipeline_mode = #tpu.pipeline_mode<synchronous>, transform_indices = @transform_2, window_bounds = array<i64: 32, 9>}, {pipeline_mode = #tpu.pipeline_mode<synchronous>, transform_indices = @transform_3, window_bounds = array<i64: 32, 2>}]} {
    %c0 = arith.constant 0 : index
    %c0_0 = arith.constant 0 : index
    %0 = vector.load %arg2[%c0, %c0_0] : memref<8x37xbf16, #tpu.memory_space<vmem>>, vector<8x37xbf16>
    %c0_1 = arith.constant 0 : index
    %c0_2 = arith.constant 0 : index
    %1 = vector.load %arg1[%c0_1, %c0_2] : memref<37x512xbf16, #tpu.memory_space<vmem>>, vector<37x512xbf16>
    %cst = arith.constant dense<0.000000e+00> : vector<8x512xf32>
    %2 = tpu.matmul %0, %1, %cst {dimension_numbers = #tpu.dot_dimension_numbers<[1], [0], [0], [1], [0, 0, 1, 1], [], []>} : vector<8x37xbf16>, vector<37x512xbf16>, vector<8x512xf32> -> vector<8x512xf32>
    %cst_3 = arith.constant 0.000000e+00 : f32
    %3 = vector.broadcast %cst_3 : f32 to vector<8x512xf32>
    %4 = arith.maximumf %2, %3 : vector<8x512xf32>
    %5 = vector.extract_strided_slice %4 {offsets = [0, 0], sizes = [8, 256], strides = [1, 1]} : vector<8x512xf32> to vector<8x256xf32>
    %cst_4 = arith.constant dense<0.000000e+00> : vector<8xf32>
    %6 = vector.multi_reduction <add>, %5, %cst_4 [1] : vector<8x256xf32> to vector<8xf32>
    %7 = vector.shape_cast %6 : vector<8xf32> to vector<8x1xf32>
    %8 = vector.extract_strided_slice %4 {offsets = [0, 256], sizes = [8, 256], strides = [1, 1]} : vector<8x512xf32> to vector<8x256xf32>
    %cst_5 = arith.constant dense<0.000000e+00> : vector<8xf32>
    %9 = vector.multi_reduction <add>, %8, %cst_5 [1] : vector<8x256xf32> to vector<8xf32>
    %10 = vector.shape_cast %9 : vector<8xf32> to vector<8x1xf32>
    %11 = tpu.iota {dimensions = array<i32: 1>} : vector<8x2xi32>
    %c0_i32 = arith.constant 0 : i32
    %12 = vector.broadcast %c0_i32 : i32 to vector<8x2xi32>
    %13 = arith.cmpi eq, %11, %12 : vector<8x2xi32>
    %14 = vector.shape_cast %7 : vector<8x1xf32> to vector<8x1xf32>
    %15 = vector.broadcast %14 : vector<8x1xf32> to vector<8x2xf32>
    %16 = vector.shape_cast %10 : vector<8x1xf32> to vector<8x1xf32>
    %17 = vector.broadcast %16 : vector<8x1xf32> to vector<8x2xf32>
    %18 = arith.select %13, %15, %17 : vector<8x2xi1>, vector<8x2xf32>
    %c0_6 = arith.constant 0 : index
    %c0_7 = arith.constant 0 : index
    %19 = vector.load %arg3[%c0_6, %c0_7] : memref<32x9xf32, #tpu.memory_space<vmem>>, vector<32x8xf32>
    %c0_8 = arith.constant 0 : index
    %c8 = arith.constant 8 : index
    %20 = vector.load %arg3[%c0_8, %c8] : memref<32x9xf32, #tpu.memory_space<vmem>>, vector<32x1xf32>
    %cst_9 = arith.constant dense<0.000000e+00> : vector<32x2xf32>
    %21 = tpu.matmul %19, %18, %cst_9 {dimension_numbers = #tpu.dot_dimension_numbers<[1], [0], [0], [1], [0, 0, 1, 1], [], []>} : vector<32x8xf32>, vector<8x2xf32>, vector<32x2xf32> -> vector<32x2xf32>
    %22 = vector.broadcast %20 : vector<32x1xf32> to vector<32x2xf32>
    %23 = arith.addf %21, %22 : vector<32x2xf32>
    %c0_10 = arith.constant 0 : index
    %c0_11 = arith.constant 0 : index
    %24 = vector.load %arg4[%c0_10, %c0_11] : memref<32x2xf32, #tpu.memory_space<vmem>>, vector<32x2xf32>
    tpu.vector_store %arg4[%c0_10, %c0_11], %23 {strides = array<i32>} : memref<32x2xf32, #tpu.memory_space<vmem>>, vector<32x2xf32>,
    return
  }
  func.func @transform_0(%arg0: i32) -> (i32, i32) {
    %c0_i32 = arith.constant 0 : i32
    %c0_i32_0 = arith.constant 0 : i32
    %c0_i32_1 = arith.constant 0 : i32
    return %c0_i32, %c0_i32_0 : i32, i32
  }
  func.func @transform_1(%arg0: i32) -> (i32, i32) {
    %c0_i32 = arith.constant 0 : i32
    %c0_i32_0 = arith.constant 0 : i32
    %c0_i32_1 = arith.constant 0 : i32
    return %c0_i32, %c0_i32_0 : i32, i32
  }
  func.func @transform_2(%arg0: i32) -> (i32, i32) {
    %c0_i32 = arith.constant 0 : i32
    %c0_i32_0 = arith.constant 0 : i32
    %c0_i32_1 = arith.constant 0 : i32
    return %c0_i32, %c0_i32_0 : i32, i32
  }
  func.func @transform_3(%arg0: i32) -> (i32, i32) {
    %c0_i32 = arith.constant 0 : i32
    %c0_i32_0 = arith.constant 0 : i32
    %c0_i32_1 = arith.constant 0 : i32
    return %c0_i32, %c0_i32_0 : i32, i32
  }
}

</mosaic_0001>

<bundles_post_ra>
// kernel: siamese_forward.1
= control target key start
LH: loop header
LB: loop body
LE: loop exit
PB: predicated region body
PF: predicated region fallthrough
CT: control target
= control target key end

     0   :  { %vm80_vm0 = vcmask 1041408   ;;  %v373_v1 = vmov 0   ;;  %vm81_vm1 = vcmask 1042432   ;;  %v374_v3 = vmov 65535   ;;  %s457_s0 = inlined_call_operand.vmem [shape: bf16[37,512], index: 0, kind: input, shape index: {}]   ;;  %s458_s1 = inlined_call_operand.vmem [shape: bf16[8,37], index: 1, kind: input, shape index: {}]   ;;  %s459_s2 = inlined_call_operand.vmem [shape: f32[32,9], index: 2, kind: input, shape index: {}]   ;;  %s460_s3 = inlined_call_operand.vmem [shape: f32[32,2], index: 3, kind: output, shape index: {}]  }
   0x1   :  { %v357_v0 = vld [vmem:[%s457_s0 + $0x4] ss:$16 sps:$4 sm:$0xff]   ;;  %128 = vmatprep.mubr.bf16.mxu0 %v373_v1  ;;  %169 = vmatprep.mubr.bf16.mxu1 %v373_v1  ;;  %v359_v2 = vld [vmem:[%s457_s0] ss:$16 sps:$4 sm:$0xff]   ;;  %v82_v4 = vsel %vm80_vm0, 4294967295, %v374_v3  ;;  %vm76_vm2 = vcmask 302080   ;;  %v188_v42 = vlaneseq }
   0x2   :  { %96 = vmatprep.subr.bf16.mxu0 %v357_v0  ;;  %v360_v5 = vld [vmem:[%s457_s0 + $0xc] ss:$16 sps:$4 sm:$0xff]   ;;  %v362_v6 = vld [vmem:[%s457_s0 + $0x8] ss:$16 sps:$4 sm:$0xff]   ;;  %v363_v7 = vld [vmem:[%s457_s0 + $0x24] ss:$16 sps:$4 sm:$0xff]  }
   0x3   :  { %97 = vmatpush1.bf16.msra.mxu0 %v359_v2  ;;  %v365_v8 = vld [vmem:[%s457_s0 + $0x20] ss:$16 sps:$4 sm:$0xff]   ;;  %137 = vmatprep.subr.bf16.mxu1 %v360_v5  ;;  %v366_v9 = vld [vmem:[%s457_s0 + $0x2c] ss:$16 sps:$4 sm:$0xff]   ;;  %v83_v10 = vsel %vm81_vm1, %v82_v4, 0  ;;  %vm216_vm3 = vcmask 64512  }
   0x4   :  { %138 = vmatpush1.bf16.msra.mxu1 %v362_v6  ;;  %98 = vmatprep.subr.bf16.mxu0 %v363_v7  ;;  %v368_v11 = vld [vmem:[%s457_s0 + $0x28] ss:$16 sps:$4 sm:$0xff]   ;;  %v24_v12 = vld [vmem:[%s457_s0 + $0x40] sm:$0x77]  ;;  %v194_v38 = vld [vmem:[%s459_s2 + $0x10] sm:$0xff]  ;;  %v375_v39 = vmov 8  }
   0x5   :  { %v25_v13 = vld [vmem:[%s457_s0 + $0x48] sm:$0x77]  ;;  %139 = vmatprep.subr.bf16.mxu1 %v366_v9  ;;  %v328_v14 = vcombine.high %v24_v12, %v24_v12  ;;  %v327_v15 = vcombine.low %v24_v12, %v24_v12  ;;  %v15_v22 = vld [vmem:[%s458_s1] sm:$0xf]  ;;  %355 = vset.pattern.permute.xlu1 %v375_v39  ;;  %v195_v41 = vld [vmem:[%s459_s2 + $0x18] sm:$0xff]  ;;  %v189_v43 = vand.u32 127, %v188_v42 }
   0x6   :  { %v330_v16 = vcombine.high %v25_v13, %v25_v13  ;;  %v329_v17 = vcombine.low %v25_v13, %v25_v13  ;;  %v192_v37 = vld [vmem:[%s459_s2] sm:$0xff]  ;;  %356 = vset.pattern.permute.xlu0 %v375_v39  ;;  %v193_v40 = vld [vmem:[%s459_s2 + $0x8] sm:$0xff]  ;;  %vm310_vm5 = vcmask 15360  }
   0x7   :  { %99 = vmatpush1.bf16.msra.mxu0 %v365_v8  ;;  %v88_v18 = vand.u32 %v328_v14, %v83_v10  ;;  %v85_v19 = vand.u32 %v327_v15, %v83_v10  ;;  %198 = vperm.xlu1 %355, %v192_v37   ;;  %vm190_vm4 = vcmp.eq.s32.totalorder %v189_v43, 0 }
   0x8   :  { %v94_v20 = vand.u32 %v330_v16, %v83_v10  ;;  %140 = vmatpush1.bf16.msra.mxu1 %v368_v11  ;;  %v91_v21 = vand.u32 %v329_v17, %v83_v10 }
   0x9   :  { %100 = vmatprep.subr.bf16.mxu0 %v88_v18 }
   0xa   :  { %141 = vmatprep.subr.bf16.mxu1 %v94_v20 }
   0xb   :  { %101 = vmatpush1.bf16.msra.mxu0 %v85_v19  ;;  %203 = vperm.xlu1 %355, %v193_v40  }
   0xc   :  { %142 = vmatpush1.bf16.msra.mxu1 %v91_v21 }
   0xe   :  { %331 = vmatmul.mubr.msk.bf16.vlgmr.msra.gmra.mrb[0].mxu0 %vm76_vm2, %v15_v22 }
   0xf   :  { %332 = vmatmul.mubr.msk.bf16.vlgmr.msra.gmra.mrb[0].mxu1 %vm76_vm2, %v15_v22  ;;  %344 = vmatprep.mubr.msk.f32.mxu0 %vm216_vm3, %v192_v37 }
  0x10   :  { %347 = vmatprep.mubr.msk.f32.mxu1 %vm216_vm3, %v194_v38  ;;  %213 = vperm.xlu1 %355, %v195_v41  }
  0x86   :  { %v199_v47 = vpop.permute.xlu1 %198 }
  0x8a   :  { %v204_v48 = vpop.permute.xlu1 %203 }
  0x8f   :  { %v214_v49 = vpop.permute.xlu1 %213 }
  0xe1   :  { %v130_v23 = vpop.f32.mrb[0].mxu0 }
  0xe2   :  { %v178_v24 = vmax.f32 %v130_v23, 0.0  ;;  %v132_v25 = vpop.f32.mrb[1].mxu0  ;;  %v171_v27 = vpop.f32.mrb[0].mxu1 }
  0xe3   :  { %v179_v26 = vmax.f32 %v132_v25, 0.0  ;;  %v134_v28 = vpop.f32.mrb[2].mxu0  ;;  %v180_v29 = vmax.f32 %v171_v27, 0.0  ;;  %v173_v30 = vpop.f32.mrb[1].mxu1 }
  0xe4   :  { %v135_v31 = vpop.f32.mrb[3].mxu0  ;;  %v181_v32 = vmax.f32 %v173_v30, 0.0  ;;  %v175_v33 = vpop.f32.mrb[2].mxu1 }
  0xe5   :  { %v182_v34 = vadd.f32 %v179_v26, %v178_v24  ;;  %v176_v35 = vpop.f32.mrb[3].mxu1 }
  0xe6   :  { %v185_v36 = vadd.f32 %v181_v32, %v180_v29 }
  0xe7   :  { %183 = vadd.xlane.f32.xlu0 %v182_v34 }
  0xeb   :  { %186 = vadd.xlane.f32.xlu0 %v185_v36 }
 0x101   :  { %208 = vperm.xlu0 %356, %v194_v38  }
 0x174   :  { %v184_v44 = vpop.xlane.xlu0 %183 }
 0x178   :  { %v187_v45 = vpop.xlane.xlu0 %186 }
 0x179   :  { %v191_v46 = vsel %vm190_vm4, %v184_v44, %v187_v45 }
 0x17a   :  { %342 = vmatprep.subr.mxu0 %v191_v46  ;;  %350 = vmatprep.subr.mxu1 %v191_v46 }
 0x17b   :  { %343 = vmatpush3.msra.mxu0 %v191_v46  ;;  %351 = vmatpush3.msra.mxu1 %v191_v46 }
 0x17c   :  { %345 = vmatmul.mubr.msk.f32.vlgmr.msra.gmra.mrb[4].mxu0 %vm216_vm3, %v193_v40  ;;  %348 = vmatmul.mubr.msk.f32.vlgmr.msra.gmra.mrb[4].mxu1 %vm216_vm3, %v195_v41 }
 0x180   :  { %v209_v50 = vpop.permute.xlu0 %208 }
 0x24f   :  { %v346_v51 = vpop.f32.mrb[4].mxu0  ;;  %v349_v52 = vpop.f32.mrb[4].mxu1 }
 0x250   :  { %v297_v53 = vadd.f32 %v346_v51, %v204_v48  ;;  %v307_v54 = vadd.f32 %v349_v52, %v214_v49  ;;  %v291_v55 = vpop.f32.mrb[5].mxu0  ;;  %v301_v56 = vpop.f32.mrb[5].mxu1 }
 0x251   :  { %v292_v57 = vadd.f32 %v291_v55, %v199_v47  ;;  %v302_v58 = vadd.f32 %v301_v56, %v209_v50 }
 0x252   :  { %312 = vst.msk [vmem:[%s460_s3 + $0x8] sm:$0xff] %vm310_vm5, %v297_v53  ;;  %314 = vst.msk [vmem:[%s460_s3 + $0x18] sm:$0xff] %vm310_vm5, %v307_v54 }
 0x253   :  { %311 = vst.msk [vmem:[%s460_s3] sm:$0xff] %vm310_vm5, %v292_v57  ;;  %313 = vst.msk [vmem:[%s460_s3 + $0x10] sm:$0xff] %vm310_vm5, %v302_v58 }

</bundles_post_ra>
